<compile_context>
chip_gen: v5e
topology: v5e:2x2
jax: 0.10.0
libtpu: 0.0.40
codegen_flags: <defaults>
</compile_context>

<pallas_src>
import functools
import math

import jax
import jax.numpy as jnp
from jax import lax
from jax.experimental import pallas as pl
from jax.experimental.pallas import tpu as pltpu


# --------------------------------------------------------------------------- #
# Helpers
# --------------------------------------------------------------------------- #

def _compiler_params(semantics, est_bytes=0):
    """dimension_semantics + explicit VMEM budget when the estimate is large."""
    vmem = None
    if est_bytes > 24 * 1024 * 1024:
        vmem = int(min(100 * 1024 * 1024, est_bytes * 3 // 2))
    return pltpu.CompilerParams(dimension_semantics=semantics,
                                vmem_limit_bytes=vmem)


def _cast_fn(mxu_dtype):
    return (lambda a: a) if mxu_dtype is None else (lambda a: a.astype(mxu_dtype))


def _ln_prologue(x_ref, g_ref, b_ref, eps):
    x = x_ref[...].astype(jnp.float32)
    mu = jnp.mean(x, axis=-1, keepdims=True)
    var = jnp.mean(jnp.square(x - mu), axis=-1, keepdims=True)
    xn = (x - mu) * lax.rsqrt(var + eps)
    return x, xn * g_ref[...].astype(jnp.float32) + b_ref[...].astype(jnp.float32)


# --------------------------------------------------------------------------- #
# Generic tiled linear:  y = x @ W + b
# --------------------------------------------------------------------------- #

def _matmul_kernel(*refs, has_bias, mxu_dtype):
    if has_bias:
        x_ref, w_ref, b_ref, o_ref, acc_ref = refs
    else:
        x_ref, w_ref, o_ref, acc_ref = refs
        b_ref = None
    cast = _cast_fn(mxu_dtype)
    kstep = pl.program_id(2)

    @pl.when(kstep == 0)
    def _():
        acc_ref[...] = jnp.zeros_like(acc_ref)

    acc_ref[...] += jnp.dot(cast(x_ref[...]), cast(w_ref[...]),
                            preferred_element_type=jnp.float32)

    @pl.when(kstep == pl.num_programs(2) - 1)
    def _():
        y = acc_ref[...]
        if has_bias:
            y = y + b_ref[...].astype(jnp.float32)
        o_ref[...] = y.astype(o_ref.dtype)


def linear(x2d, w, b=None, *, tm=256, tn=256, tk=512, mxu_dtype=None):
    """x2d: (M, K), w: (K, N), b: (N,) or None  ->  (M, N). Tiled + pipelined."""
    M, K = x2d.shape
    N = w.shape[1]

    tm = M if M <= tm else tm
    tn = N if N <= tn else tn
    if K <= tk:
        tk = K
    elif K % tk:
        # Avoid jnp.pad HBM copies: pick a 128-multiple divisor of K, else K.
        tk = next((c for c in range(tk, 0, -128) if K % c == 0), K)

    grid = (pl.cdiv(M, tm), pl.cdiv(N, tn), K // tk)
    has_bias = b is not None

    in_specs = [
        pl.BlockSpec((tm, tk), lambda i, j, k: (i, k)),
        pl.BlockSpec((tk, tn), lambda i, j, k: (k, j)),
    ]
    args = [x2d, w]
    if has_bias:
        in_specs.append(pl.BlockSpec((1, tn), lambda i, j, k: (0, j)))
        args.append(b.reshape(1, N))

    est = 4 * (2 * (tm * tk + tk * tn) + 3 * tm * tn)
    kern = functools.partial(_matmul_kernel, has_bias=has_bias,
                             mxu_dtype=mxu_dtype)
    return pl.pallas_call(
        kern,
        grid=grid,
        in_specs=in_specs,
        out_specs=pl.BlockSpec((tm, tn), lambda i, j, k: (i, j)),
        out_shape=jax.ShapeDtypeStruct((M, N), x2d.dtype),
        scratch_shapes=[pltpu.VMEM((tm, tn), jnp.float32)],
        compiler_params=_compiler_params(("parallel", "parallel", "arbitrary"),
                                         est),
    )(*args)


# --------------------------------------------------------------------------- #
# Fused LayerNorm1 + single fused Q/K/V projection (row-tiled)
# --------------------------------------------------------------------------- #

def _ln_qkv_kernel(x_ref, g_ref, b_ref, w_ref, q_ref, kv_ref, *, eps, hq,
                   mxu_dtype):
    cast = _cast_fn(mxu_dtype)
    _, xn = _ln_prologue(x_ref, g_ref, b_ref, eps)
    # One MXU weight push: W = [wq*scale | wk | wv]  (scale folded at init).
    y = jnp.dot(cast(xn), cast(w_ref[...]), preferred_element_type=jnp.float32)
    q_ref[...] = y[:, :hq].astype(q_ref.dtype)
    kv_ref[...] = y[:, hq:].astype(kv_ref.dtype)


def ln_qkv(x2d, ln_g, ln_b, w_qkv, *, hq, eps=1e-5, tm=256, mxu_dtype=None):
    M, D = x2d.shape
    tot = w_qkv.shape[1]
    hkv2 = tot - hq
    tm = M if M <= tm else tm
    row = lambda i: (i, 0)
    full = lambda i: (0, 0)
    est = 4 * (2 * tm * D + D * tot + 3 * tm * tot)
    kern = functools.partial(_ln_qkv_kernel, eps=eps, hq=hq,
                             mxu_dtype=mxu_dtype)
    return pl.pallas_call(
        kern,
        grid=(pl.cdiv(M, tm),),
        in_specs=[
            pl.BlockSpec((tm, D), row),
            pl.BlockSpec((1, D), full),
            pl.BlockSpec((1, D), full),
            pl.BlockSpec((D, tot), full),
        ],
        out_specs=[
            pl.BlockSpec((tm, hq), row),
            pl.BlockSpec((tm, hkv2), row),
        ],
        out_shape=[
            jax.ShapeDtypeStruct((M, hq), x2d.dtype),
            jax.ShapeDtypeStruct((M, hkv2), x2d.dtype),
        ],
        compiler_params=_compiler_params(("parallel",), est),
    )(x2d, ln_g.reshape(1, D), ln_b.reshape(1, D), w_qkv)


# --------------------------------------------------------------------------- #
# Fused attention: Linformer seq-compression of K/V + multi-head attention +
# W_o projection + residual.  grid = (batch, query tiles).
# --------------------------------------------------------------------------- #

def _attn_kernel(q_ref, kv_ref, pk_ref, pv_ref, x_ref, wo_ref, wob_ref, o_ref,
                 kvc_ref, ctx_ref, *, heads, dim_head, kv_dim, one_kv_head,
                 mxu_dtype):
    cast = _cast_fn(mxu_dtype)

    # Compress K and V along the sequence once per batch (first query tile);
    # result lives in VMEM scratch and is reused across query tiles.
    @pl.when(pl.program_id(1) == 0)
    def _():
        kv = kv_ref[0]                                   # (n, 2*kv_dim)
        kvc_ref[0] = jnp.dot(cast(pk_ref[...]), cast(kv[:, :kv_dim]),
                             preferred_element_type=jnp.float32)
        kvc_ref[1] = jnp.dot(cast(pv_ref[...]), cast(kv[:, kv_dim:]),
                             preferred_element_type=jnp.float32)

    q = q_ref[0].astype(jnp.float32)                     # (tq, heads*dh), scale folded into wq
    kc = kvc_ref[0]                                      # (klen, kv_dim) f32
    vc = kvc_ref[1]
    dn = (((1,), (1,)), ((), ()))                        # contract on dim_head

    # Heads split with static lane slices; per-head ctx written into a single
    # lane-dense (tq, heads*dh) scratch so W_o is one K=heads*dh contraction.
    for h in range(heads):
        sl = slice(h * dim_head, (h + 1) * dim_head)
        qh = q[:, sl]
        kh = kc if one_kv_head else kc[:, sl]            # shared KV: no broadcast copies
        vh = vc if one_kv_head else vc[:, sl]
        d = lax.dot_general(cast(qh), cast(kh), dn,
                            preferred_element_type=jnp.float32)   # (tq, klen)
        d = d - jnp.max(d, axis=-1, keepdims=True)
        p = jnp.exp(d)
        p = p * pl.reciprocal(jnp.sum(p, axis=-1, keepdims=True), approx=True)
        ctx_ref[:, sl] = jnp.dot(cast(p), cast(vh),
                                 preferred_element_type=jnp.float32)

    y = jnp.dot(cast(ctx_ref[...]), cast(wo_ref[...]),
                preferred_element_type=jnp.float32)      # single W_o matmul
    y = y + wob_ref[...].astype(jnp.float32) + x_ref[0].astype(jnp.float32)
    o_ref[0] = y.astype(o_ref.dtype)


def attention_block(q3, kv3, pk_t, pv_t, x3, wo, wo_b, *, heads, dim_head,
                    kv_dim, one_kv_head, tq=128, mxu_dtype=None):
    b, n, hq = q3.shape
    dim = x3.shape[-1]
    klen = pk_t.shape[0]
    if n <= tq or n % tq:
        tq = n                                  # single query tile (small seq)
    n_qt = n // tq

    est = 4 * (2 * (tq * hq + n * 2 * kv_dim + 2 * tq * dim)
               + 2 * klen * n + hq * dim + 2 * klen * kv_dim + tq * hq)
    kern = functools.partial(_attn_kernel, heads=heads, dim_head=dim_head,
                             kv_dim=kv_dim, one_kv_head=one_kv_head,
                             mxu_dtype=mxu_dtype)
    return pl.pallas_call(
        kern,
        grid=(b, n_qt),
        in_specs=[
            pl.BlockSpec((1, tq, hq), lambda bi, qi: (bi, qi, 0)),
            pl.BlockSpec((1, n, 2 * kv_dim), lambda bi, qi: (bi, 0, 0)),
            pl.BlockSpec((klen, n), lambda bi, qi: (0, 0)),
            pl.BlockSpec((klen, n), lambda bi, qi: (0, 0)),
            pl.BlockSpec((1, tq, dim), lambda bi, qi: (bi, qi, 0)),
            pl.BlockSpec((hq, dim), lambda bi, qi: (0, 0)),
            pl.BlockSpec((1, dim), lambda bi, qi: (0, 0)),
        ],
        out_specs=pl.BlockSpec((1, tq, dim), lambda bi, qi: (bi, qi, 0)),
        out_shape=jax.ShapeDtypeStruct((b, n, dim), x3.dtype),
        scratch_shapes=[pltpu.VMEM((2, klen, kv_dim), jnp.float32),
                        pltpu.VMEM((tq, hq), jnp.float32)],
        compiler_params=_compiler_params(("parallel", "arbitrary"), est),
    )(q3, kv3, pk_t, pv_t, x3, wo, wo_b.reshape(1, dim))


# --------------------------------------------------------------------------- #
# Fused FeedForward: LN2 + FF1 + GELU + FF2 + residual (row-tiled)
# --------------------------------------------------------------------------- #

def _ffn_kernel(x_ref, g_ref, b_ref, w1_ref, b1_ref, w2_ref, b2_ref, o_ref,
                *, eps, mxu_dtype):
    cast = _cast_fn(mxu_dtype)
    x, xn = _ln_prologue(x_ref, g_ref, b_ref, eps)
    h = jnp.dot(cast(xn), cast(w1_ref[...]), preferred_element_type=jnp.float32)
    h = h + b1_ref[...].astype(jnp.float32)
    # TODO(synk): torch nn.GELU defaults to exact erf; tanh approx used here.
    h = jax.nn.gelu(h, approximate=True)
    y = jnp.dot(cast(h), cast(w2_ref[...]), preferred_element_type=jnp.float32)
    y = y + b2_ref[...].astype(jnp.float32)
    o_ref[...] = (x + y).astype(o_ref.dtype)


def ffn_block(x2d, g, bta, w1, b1, w2, b2, *, eps=1e-5, tm=256, mxu_dtype=None):
    M, D = x2d.shape
    Hd = w1.shape[1]
    tm = M if M <= tm else tm
    row = lambda i: (i, 0)
    full = lambda i: (0, 0)
    # TODO(synk): on v7x at large mlp_dim, store w1/w2 as bf16 and/or tile over
    # mlp_dim with a K-axis accumulator for the second matmul.
    est = 4 * (4 * tm * D + 2 * D * Hd + 2 * tm * Hd + Hd + D)
    kern = functools.partial(_ffn_kernel, eps=eps, mxu_dtype=mxu_dtype)
    return pl.pallas_call(
        kern,
        grid=(pl.cdiv(M, tm),),
        in_specs=[
            pl.BlockSpec((tm, D), row),
            pl.BlockSpec((1, D), full),
            pl.BlockSpec((1, D), full),
            pl.BlockSpec((D, Hd), full),
            pl.BlockSpec((1, Hd), full),
            pl.BlockSpec((Hd, D), full),
            pl.BlockSpec((1, D), full),
        ],
        out_specs=pl.BlockSpec((tm, D), row),
        out_shape=jax.ShapeDtypeStruct((M, D), x2d.dtype),
        compiler_params=_compiler_params(("parallel",), est),
    )(x2d, g.reshape(1, D), bta.reshape(1, D), w1, b1.reshape(1, Hd),
      w2, b2.reshape(1, D))


# --------------------------------------------------------------------------- #
# Fused head: final LayerNorm + classifier linear (tiny, single block)
# --------------------------------------------------------------------------- #

def _head_kernel(x_ref, g_ref, b_ref, w_ref, wb_ref, o_ref, *, eps, mxu_dtype):
    cast = _cast_fn(mxu_dtype)
    _, xn = _ln_prologue(x_ref, g_ref, b_ref, eps)
    y = jnp.dot(cast(xn), cast(w_ref[...]), preferred_element_type=jnp.float32)
    o_ref[...] = (y + wb_ref[...].astype(jnp.float32)).astype(o_ref.dtype)


def head_block(pooled, g, bta, w, wb, *, eps=1e-5, mxu_dtype=None):
    B, D = pooled.shape
    N = w.shape[1]
    kern = functools.partial(_head_kernel, eps=eps, mxu_dtype=mxu_dtype)
    return pl.pallas_call(
        kern, out_shape=jax.ShapeDtypeStruct((B, N), pooled.dtype),
    )(pooled, g.reshape(1, D), bta.reshape(1, D), w, wb.reshape(1, N))


# ------------------------------ Parameter init ----------------------------- #

def _uniform(key, shape, bound):
    return jax.random.uniform(key, shape, minval=-bound, maxval=bound,
                              dtype=jnp.float32)


def _init_linear(key, fan_in, fan_out, bias=True):
    kw, kb = jax.random.split(key)
    bound = 1.0 / math.sqrt(fan_in)
    w = _uniform(kw, (fan_in, fan_out), bound)
    b = _uniform(kb, (fan_out,), bound) if bias else None
    return w, b


def init_params(key, *, image_size, patch_size, channels, num_classes, dim,
                depth, heads, dim_head, mlp_dim, k, one_kv_head=False,
                share_kv=False):
    num_patches = (image_size // patch_size) ** 2
    patch_dim = channels * patch_size ** 2
    seq_len = num_patches + 1
    kv_dim = dim_head if one_kv_head else dim_head * heads
    hq = dim_head * heads
    scale = dim_head ** -0.5

    keys = jax.random.split(key, 4 + depth)
    params = {}
    params['patch_w'], params['patch_b'] = _init_linear(keys[0], patch_dim, dim)
    params['pos_emb'] = jax.random.normal(keys[1], (1, seq_len, dim), jnp.float32)
    params['cls_token'] = jax.random.uniform(keys[2], (1, 1, dim),
                                             dtype=jnp.float32)

    layers = []
    for i in range(depth):
        lk = jax.random.split(keys[4 + i], 8)
        proj_bound = 1.0 / math.sqrt(k)
        wq, _ = _init_linear(lk[0], dim, hq, bias=False)
        wk, _ = _init_linear(lk[1], dim, kv_dim, bias=False)
        proj_k = _uniform(lk[2], (seq_len, k), proj_bound)
        if share_kv:
            wv, proj_v = wk, proj_k
        else:
            wv, _ = _init_linear(lk[3], dim, kv_dim, bias=False)
            proj_v = _uniform(lk[4], (seq_len, k), proj_bound)
        wo, wo_b = _init_linear(lk[5], hq, dim)
        ff1_w, ff1_b = _init_linear(lk[6], dim, mlp_dim)
        ff2_w, ff2_b = _init_linear(lk[7], mlp_dim, dim)
        layers.append({
            'ln1_g': jnp.ones((dim,), jnp.float32),
            'ln1_b': jnp.zeros((dim,), jnp.float32),
            'ln2_g': jnp.ones((dim,), jnp.float32),
            'ln2_b': jnp.zeros((dim,), jnp.float32),
            # Attention scale folded into the Q columns (wq has no bias -> exact).
            'w_qkv': jnp.concatenate([wq * scale, wk, wv], axis=1),
            # Linformer projections stored pre-transposed: (k, seq_len).
            'proj_k_t': jnp.transpose(proj_k),
            'proj_v_t': jnp.transpose(proj_v),
            'wo': wo, 'wo_b': wo_b,
            'ff1_w': ff1_w, 'ff1_b': ff1_b,
            'ff2_w': ff2_w, 'ff2_b': ff2_b,
            'kv_dim': kv_dim, 'one_kv_head': one_kv_head,
        })
    params['layers'] = layers

    params['head_ln_g'] = jnp.ones((dim,), jnp.float32)
    params['head_ln_b'] = jnp.zeros((dim,), jnp.float32)
    params['head_w'], params['head_b'] = _init_linear(keys[3], dim, num_classes)
    return params


# ------------------------------- Forward pass ------------------------------ #

def lin_vit_forward(params, img, *, patch_size, heads, dim_head, pool='cls',
                    mxu_dtype=None):
    b, c, H, W = img.shape
    p = patch_size
    hh, ww = H // p, W // p
    # Rearrange 'b c (h p1) (w p2) -> b (h w) (p1 p2 c)'  (XLA glue)
    x = img.reshape(b, c, hh, p, ww, p)
    x = jnp.transpose(x, (0, 2, 4, 3, 5, 1)).reshape(b, hh * ww, p * p * c)
    n_p = hh * ww
    dim = params['patch_w'].shape[1]
    hq = heads * dim_head

    # Patch embedding (tiled Pallas matmul)
    x = linear(x.reshape(b * n_p, -1), params['patch_w'], params['patch_b'],
               mxu_dtype=mxu_dtype)
    x = x.reshape(b, n_p, dim)

    # cls token + positional embedding (glue elementwise); emb_dropout p=0.0
    cls = jnp.broadcast_to(params['cls_token'], (b, 1, dim))
    x = jnp.concatenate([cls, x], axis=1)
    n = n_p + 1
    x = x + params['pos_emb'][:, :n]

    for layer in params['layers']:
        kv_dim = layer['kv_dim']

        # --- fused LN1 + single QKV matmul (lane-dense q / kv outputs) ---
        q2d, kv2d = ln_qkv(x.reshape(b * n, dim), layer['ln1_g'],
                           layer['ln1_b'], layer['w_qkv'], hq=hq,
                           mxu_dtype=mxu_dtype)

        # --- fused seq-compression + attention + W_o + residual ---
        # (reshapes below are metadata-only; no head-split transposes)
        x = attention_block(q2d.reshape(b, n, hq),
                            kv2d.reshape(b, n, 2 * kv_dim),
                            layer['proj_k_t'], layer['proj_v_t'],
                            x, layer['wo'], layer['wo_b'],
                            heads=heads, dim_head=dim_head, kv_dim=kv_dim,
                            one_kv_head=layer['one_kv_head'],
                            mxu_dtype=mxu_dtype)

        # --- fused LN2 + FFN + residual ---
        x = ffn_block(x.reshape(b * n, dim), layer['ln2_g'], layer['ln2_b'],
                      layer['ff1_w'], layer['ff1_b'],
                      layer['ff2_w'], layer['ff2_b'],
                      mxu_dtype=mxu_dtype).reshape(b, n, dim)

    pooled = x.mean(axis=1) if pool == 'mean' else x[:, 0]
    return head_block(pooled, params['head_ln_g'], params['head_ln_b'],
                      params['head_w'], params['head_b'], mxu_dtype=mxu_dtype)


# ----------------------------------- main ----------------------------------- #

if __name__ == "__main__":
    key = jax.random.PRNGKey(0)
    k_img, k_param = jax.random.split(key)

    image_size, patch_size, channels = 16, 4, 3
    dim, depth, heads, mlp_dim, k_lin = 32, 2, 4, 64, 8
    num_classes = 10
    dim_head = dim // heads        # dim_head=None in the module -> dim // heads
    batch = 2

    img = jax.random.normal(k_img, (batch, channels, image_size, image_size),
                            dtype=jnp.float32)
    params = init_params(
        k_param, image_size=image_size, patch_size=patch_size,
        channels=channels, num_classes=num_classes, dim=dim, depth=depth,
        heads=heads, dim_head=dim_head, mlp_dim=mlp_dim, k=k_lin,
        one_kv_head=False, share_kv=False)

    # mxu_dtype=None keeps exact f32 semantics of the reference; set
    # jnp.bfloat16 on v5e/v6e/v7x for the MXU fast path (f32 accumulation kept).
    logits = lin_vit_forward(params, img, patch_size=patch_size, heads=heads,
                             dim_head=dim_head, pool='cls', mxu_dtype=None)
    logits = jax.block_until_ready(logits)
    assert logits.shape == (batch, num_classes)
    assert bool(jnp.all(jnp.isfinite(logits)))
    print("KERNEL_OK")
</pallas_src>

<mosaic_0001>
module attributes {stable_mosaic.version = 11 : i64} {
  func.func @_matmul_kernel(%arg0: i32, %arg1: i32, %arg2: i32, %arg3: memref<32x48xf32, #tpu.memory_space<vmem>>, %arg4: memref<48x32xf32, #tpu.memory_space<vmem>>, %arg5: memref<1x32xf32, #tpu.memory_space<vmem>>, %arg6: memref<32x32xf32, #tpu.memory_space<vmem>>, %arg7: memref<32x32xf32, #tpu.memory_space<vmem>>) attributes {dimension_semantics = [#tpu.dimension_semantics<parallel>, #tpu.dimension_semantics<parallel>, #tpu.dimension_semantics<arbitrary>], iteration_bounds = array<i64: 1, 1, 1>, scalar_prefetch = 0 : i64, scratch_operands = 1 : i64, tpu.core_type = #tpu.core_type<tc>, window_params = [{transform_indices = @transform_0, window_bounds = array<i64: 32, 48>}, {transform_indices = @transform_1, window_bounds = array<i64: 48, 32>}, {transform_indices = @transform_2, window_bounds = array<i64: 1, 32>}, {transform_indices = @transform_3, window_bounds = array<i64: 32, 32>}]} {
    %c0_i32 = arith.constant 0 : i32
    %0 = arith.cmpi eq, %arg2, %c0_i32 : i32
    %1 = arith.extui %0 : i1 to i32
    %c0_i32_0 = arith.constant 0 : i32
    %2 = arith.cmpi ne, %1, %c0_i32_0 : i32
    scf.if %2 {
      %cst_10 = arith.constant 0.000000e+00 : f32
      %12 = vector.broadcast %cst_10 : f32 to vector<32x32xf32>
      %c0_11 = arith.constant 0 : index
      %c0_12 = arith.constant 0 : index
      %13 = vector.load %arg7[%c0_11, %c0_12] : memref<32x32xf32, #tpu.memory_space<vmem>>, vector<32x32xf32>
      tpu.vector_store %arg7[%c0_11, %c0_12], %12 {strides = array<i32>} : memref<32x32xf32, #tpu.memory_space<vmem>>, vector<32x32xf32>,
    } else {
    }
    %c0 = arith.constant 0 : index
    %c0_1 = arith.constant 0 : index
    %3 = vector.load %arg7[%c0, %c0_1] : memref<32x32xf32, #tpu.memory_space<vmem>>, vector<32x32xf32>
    %c0_2 = arith.constant 0 : index
    %c0_3 = arith.constant 0 : index
    %4 = vector.load %arg3[%c0_2, %c0_3] : memref<32x48xf32, #tpu.memory_space<vmem>>, vector<32x48xf32>
    %c0_4 = arith.constant 0 : index
    %c0_5 = arith.constant 0 : index
    %5 = vector.load %arg4[%c0_4, %c0_5] : memref<48x32xf32, #tpu.memory_space<vmem>>, vector<48x32xf32>
    %cst = arith.constant dense<0.000000e+00> : vector<32x32xf32>
    %6 = tpu.matmul %4, %5, %cst {dimension_numbers = #tpu.dot_dimension_numbers<[1], [0], [0], [1], [0, 0, 1, 1], [], []>} : vector<32x48xf32>, vector<48x32xf32>, vector<32x32xf32> -> vector<32x32xf32>
    %7 = arith.addf %3, %6 : vector<32x32xf32>
    %c0_6 = arith.constant 0 : index
    %c0_7 = arith.constant 0 : index
    %8 = vector.load %arg7[%c0_6, %c0_7] : memref<32x32xf32, #tpu.memory_space<vmem>>, vector<32x32xf32>
    tpu.vector_store %arg7[%c0_6, %c0_7], %7 {strides = array<i32>} : memref<32x32xf32, #tpu.memory_space<vmem>>, vector<32x32xf32>,
    %c0_i32_8 = arith.constant 0 : i32
    %9 = arith.cmpi eq, %arg2, %c0_i32_8 : i32
    %10 = arith.extui %9 : i1 to i32
    %c0_i32_9 = arith.constant 0 : i32
    %11 = arith.cmpi ne, %10, %c0_i32_9 : i32
    scf.if %11 {
      %c0_10 = arith.constant 0 : index
      %c0_11 = arith.constant 0 : index
      %12 = vector.load %arg7[%c0_10, %c0_11] : memref<32x32xf32, #tpu.memory_space<vmem>>, vector<32x32xf32>
      %c0_12 = arith.constant 0 : index
      %c0_13 = arith.constant 0 : index
      %13 = vector.load %arg5[%c0_12, %c0_13] : memref<1x32xf32, #tpu.memory_space<vmem>>, vector<1x32xf32>
      %14 = vector.broadcast %13 : vector<1x32xf32> to vector<32x32xf32>
      %15 = arith.addf %12, %14 : vector<32x32xf32>
      %c0_14 = arith.constant 0 : index
      %c0_15 = arith.constant 0 : index
      %16 = vector.load %arg6[%c0_14, %c0_15] : memref<32x32xf32, #tpu.memory_space<vmem>>, vector<32x32xf32>
      tpu.vector_store %arg6[%c0_14, %c0_15], %15 {strides = array<i32>} : memref<32x32xf32, #tpu.memory_space<vmem>>, vector<32x32xf32>,
    } else {
    }
    return
  }
  func.func @transform_0(%arg0: i32, %arg1: i32, %arg2: i32) -> (i32, i32) {
    %c0_i32 = arith.constant 0 : i32
    return %arg0, %arg2 : i32, i32
  }
  func.func @transform_1(%arg0: i32, %arg1: i32, %arg2: i32) -> (i32, i32) {
    %c0_i32 = arith.constant 0 : i32
    return %arg2, %arg1 : i32, i32
  }
  func.func @transform_2(%arg0: i32, %arg1: i32, %arg2: i32) -> (i32, i32) {
    %c0_i32 = arith.constant 0 : i32
    %c0_i32_0 = arith.constant 0 : i32
    return %c0_i32, %arg1 : i32, i32
  }
  func.func @transform_3(%arg0: i32, %arg1: i32, %arg2: i32) -> (i32, i32) {
    %c0_i32 = arith.constant 0 : i32
    return %arg0, %arg1 : i32, i32
  }
}

</mosaic_0001>

<bundles_post_ra>
// kernel: tpu_custom_call.1
= control target key start
LH: loop header
LB: loop body
LE: loop exit
PB: predicated region body
PF: predicated region fallthrough
CT: control target
= control target key end

     0   :  { %vm19_vm0 = vcmask 261120   ;;  %v179_v2 = vmov 0.0   ;;  %s251_s0 = inlined_call_operand.vmem [shape: f32[32,48], index: 0, kind: input, shape index: {}]   ;;  %s252_s1 = inlined_call_operand.vmem [shape: f32[48,32], index: 1, kind: input, shape index: {}]   ;;  %s253_s2 = inlined_call_operand.vmem [shape: f32[1,32], index: 2, kind: input, shape index: {}]   ;;  %s254_s3 = inlined_call_operand.hbm [shape: f32[32,32], index: 3, kind: output, shape index: {}]  }
   0x1   :  { %v37_v0 = vld [vmem:[%s252_s1 + $0x28] sm:$0xff]  ;;  %v36_v1 = vld [vmem:[%s252_s1 + $0x20] sm:$0xff]  ;;  %20 = vst.msk [vmem:[#allocation2] sm:$0xff] %vm19_vm0, %v179_v2  ;;  %v35_v3 = vld [vmem:[%s252_s1 + $0x18] sm:$0xff] }
   0x2   :  { %131 = vmatpush.msra.mxu2 %v37_v0  ;;  %132 = vmatpush.msra.mxu3 %v37_v0  ;;  %21 = vst.msk [vmem:[#allocation2 + $0x8] sm:$0xff] %vm19_vm0, %v179_v2 }
   0x3   :  { %61 = vmatpush.msra.mxu0 %v37_v0  ;;  %130 = vmatpush.msra.mxu1 %v37_v0  ;;  %22 = vst.msk [vmem:[#allocation2 + $0x10] sm:$0xff] %vm19_vm0, %v179_v2 }
   0x4   :  { %134 = vmatpush.msra.mxu2 %v36_v1  ;;  %135 = vmatpush.msra.mxu3 %v36_v1 }
   0x5   :  { %8 = vsyncpa [#allocation4], 0  ;;  %v34_v4 = vld [vmem:[%s252_s1 + $0x10] sm:$0xff]  ;;  %62 = vmatpush.msra.mxu0 %v36_v1  ;;  %133 = vmatpush.msra.mxu1 %v36_v1  ;;  %23 = vst.msk [vmem:[#allocation2 + $0x18] sm:$0xff] %vm19_vm0, %v179_v2  ;;  %v33_v5 = vld [vmem:[%s252_s1 + $0x8] sm:$0xff]  ;;  %vm38_vm1 = vcmask 392192  }
   0x6   :  { %137 = vmatpush.msra.mxu2 %v35_v3  ;;  %138 = vmatpush.msra.mxu3 %v35_v3  ;;  %v32_v6 = vld [vmem:[%s252_s1] sm:$0xff]  ;;  %v30_v7 = vld [vmem:[%s251_s0 + $0x10] sm:$0xff]  ;;  %v31_v8 = vld [vmem:[%s251_s0 + $0x18] sm:$0xff]  ;;  %s180_s5 = smov [#allocation3]   ;;  %s114_s9 = sshll.u32 %s254_s3, 4  ;;  %s115_s9 = int_to_ptr.hbm [resolvable:$true] %s114_s9 }
   0x7   :  { %63 = vmatpush.msra.mxu0 %v35_v3  ;;  %136 = vmatpush.msra.mxu1 %v35_v3  ;;  %v28_v9 = vld [vmem:[%s251_s0] sm:$0xff]  ;;  %v29_v10 = vld [vmem:[%s251_s0 + $0x8] sm:$0xff]  ;;  %s112_s6 = sshll.u32 %s180_s5, 4  ;;  %s182_s10 = smov 8   ;;  %s113_s6 = int_to_ptr.vmem [resolvable:$true] %s112_s6 }
   0x8   :  { %140 = vmatpush.msra.mxu2 %v34_v4  ;;  %141 = vmatpush.msra.mxu3 %v34_v4  ;;  %v24_v11 = vld [vmem:[#allocation2] sm:$0xff] }
   0x9   :  { %64 = vmatpush.msra.mxu0 %v34_v4  ;;  %139 = vmatpush.msra.mxu1 %v34_v4  ;;  %v25_v12 = vld [vmem:[#allocation2 + $0x8] sm:$0xff]  ;;  %v152_v23 = vld [vmem:[%s253_s2] ss:$0 sm:$0xff]  ;;  %s181_s2 = smov 128  }
   0xa   :  { %143 = vmatpush.msra.mxu2 %v33_v5  ;;  %144 = vmatpush.msra.mxu3 %v33_v5  ;;  %v26_v17 = vld [vmem:[#allocation2 + $0x10] sm:$0xff] }
   0xb   :  { %65 = vmatpush.msra.mxu0 %v33_v5  ;;  %142 = vmatpush.msra.mxu1 %v33_v5 }
   0xc   :  { %146 = vmatpush.msra.mxu2 %v32_v6  ;;  %147 = vmatpush.msra.mxu3 %v32_v6  ;;  %v27_v18 = vld [vmem:[#allocation2 + $0x18] sm:$0xff] }
   0xd   :  { %128 = vmatmul.msk.f32.vlgmr.msra.gmra.mxu2 %vm38_vm1, %v30_v7  ;;  %129 = vmatmul.msk.f32.vlgmr.msra.gmra.mxu3 %vm38_vm1, %v31_v8 }
   0xe   :  { %66 = vmatpush.msra.mxu0 %v32_v6  ;;  %145 = vmatpush.msra.mxu1 %v32_v6 }
   0xf   :  { %126 = vmatmul.msk.f32.vlgmr.msra.gmra.mxu0 %vm38_vm1, %v28_v9  ;;  %127 = vmatmul.msk.f32.vlgmr.msra.gmra.mxu1 %vm38_vm1, %v29_v10 }
  0x8c   :  { %v68_v13 = vpop.f32.mrf.mxu0  ;;  %v71_v14 = vpop.f32.mrf.mxu1 }
  0x8d   :  { %v80_v15 = vadd.f32 %v68_v13, %v24_v11  ;;  %v81_v16 = vadd.f32 %v71_v14, %v25_v12 }
  0x8f   :  { %85 = vst.msk [vmem:[#allocation2] sm:$0xff] %vm19_vm0, %v80_v15 }
  0x90   :  { %86 = vst.msk [vmem:[#allocation2 + $0x8] sm:$0xff] %vm19_vm0, %v81_v16  ;;  %v74_v19 = vpop.f32.mrf.mxu2  ;;  %v77_v20 = vpop.f32.mrf.mxu3 }
  0x91   :  { %v82_v21 = vadd.f32 %v74_v19, %v26_v17  ;;  %v83_v22 = vadd.f32 %v77_v20, %v27_v18 }
  0x93   :  { %87 = vst.msk [vmem:[#allocation2 + $0x10] sm:$0xff] %vm19_vm0, %v82_v21 }
  0x94   :  { %88 = vst.msk [vmem:[#allocation2 + $0x18] sm:$0xff] %vm19_vm0, %v83_v22 }
  0x96   :  { %v92_v24 = vld [vmem:[#allocation2] sm:$0xff] }
  0x97   :  { %v93_v25 = vld [vmem:[#allocation2 + $0x8] sm:$0xff]  ;;  %v100_v26 = vadd.f32 %v152_v23, %v92_v24 }
  0x98   :  { %v101_v27 = vadd.f32 %v152_v23, %v93_v25 }
  0x99   :  { %104 = vst.msk [vmem:[#allocation3] sm:$0xff] %vm19_vm0, %v100_v26 }
  0x9a   :  { %v94_v28 = vld [vmem:[#allocation2 + $0x10] sm:$0xff]  ;;  %105 = vst.msk [vmem:[#allocation3 + $0x8] sm:$0xff] %vm19_vm0, %v101_v27 }
  0x9b   :  { %v95_v29 = vld [vmem:[#allocation2 + $0x18] sm:$0xff]  ;;  %v102_v30 = vadd.f32 %v152_v23, %v94_v28 }
  0x9c   :  { %v103_v31 = vadd.f32 %v152_v23, %v95_v29 }
  0x9d   :  { %106 = vst.msk [vmem:[#allocation3 + $0x10] sm:$0xff] %vm19_vm0, %v102_v30 }
  0x9e   :  { %107 = vst.msk [vmem:[#allocation3 + $0x18] sm:$0xff] %vm19_vm0, %v103_v31 }
  0x9f   :  { %120 = dma.vmem_to_hbm [thread:$0]  %s113_s6, 512, %s115_s9, [#allocation4], %s181_s2, %s181_s2, %s182_s10  }
  0xa0   :  { %177 = dma.done.wait [#allocation4], 512  }
  0xa1   :  { %178 = vsyncadd [#allocation4], 4294966784 }
  0xa2   :  { %125 = vsyncpa [#allocation4], 1 }

</bundles_post_ra>
